<compile_context>
chip_gen: v7x
topology: tpu7x:2x2x1
jax: 0.10.0
libtpu: 0.0.40
codegen_flags: <defaults>
</compile_context>

<pallas_src>
import functools

import jax
import jax.numpy as jnp
from jax import lax
from jax.experimental import pallas as pl
from jax.experimental.pallas import tpu as pltpu


def _round_up(v, m):
    return ((v + m - 1) // m) * m


def _pow_gamma(one_minus_pt, gamma):
    """(1 - pt) ** gamma.  Integer gamma -> square-and-multiply on the VPU
    (gamma=2 is a single multiply), keeping the lone EUP slot free for the
    softmax exp / pt = exp(logpt)."""
    g = float(gamma)
    if g == 0.0:
        return jnp.ones_like(one_minus_pt)
    if g.is_integer() and 0.0 < g <= 16.0:
        e = int(g)
        acc = None
        base = one_minus_pt
        while True:
            if e & 1:
                acc = base if acc is None else acc * base
            e >>= 1
            if not e:
                return acc
            base = base * base
    return jnp.power(one_minus_pt, jnp.float32(g))


def _loss_classes_on_sublanes(gamma, use_alpha, x, t, a_ref):
    """Per-sample focal loss, classes-on-sublanes layout (C < 128).

    x: (C, L) f32 logits, t: (1, L) int32 targets, a_ref: (C, 1) f32 alpha.
    Returns a lane-dense (1, L) f32 loss."""
    m = jnp.max(x, axis=0, keepdims=True)                       # (1, L)
    z = x - m
    lse = jnp.log(jnp.sum(jnp.exp(z), axis=0, keepdims=True))   # (1, L)
    cls = lax.broadcasted_iota(jnp.int32, x.shape, 0)           # (C, L)
    onehot = (cls == t).astype(jnp.float32)                     # (C, L)
    # Gather the target logit from z directly; logp = z - lse is never
    # materialized (one fewer full-width subtract + live (C, L) temporary).
    zt = jnp.sum(z * onehot, axis=0, keepdims=True)             # (1, L)
    logpt = zt - lse
    pt = jnp.exp(logpt)
    if use_alpha:
        a = a_ref[...].astype(jnp.float32)                      # (C, 1)
        at = jnp.sum(a * onehot, axis=0, keepdims=True)         # (1, L)
        logpt = logpt * at
    return -_pow_gamma(1.0 - pt, gamma) * logpt                 # (1, L)


def _loss_classes_on_lanes(gamma, use_alpha, x, t, a_ref):
    """Per-sample focal loss, natural (rows, classes) layout for C >= 128.

    x: (L, C) f32, t: (L, 1) int32, a_ref: (1, C) f32.  Returns (L, 1) f32."""
    m = jnp.max(x, axis=-1, keepdims=True)
    z = x - m
    lse = jnp.log(jnp.sum(jnp.exp(z), axis=-1, keepdims=True))
    cls = lax.broadcasted_iota(jnp.int32, x.shape, 1)
    onehot = (cls == t).astype(jnp.float32)
    zt = jnp.sum(z * onehot, axis=-1, keepdims=True)
    logpt = zt - lse
    pt = jnp.exp(logpt)
    if use_alpha:
        a = a_ref[...].astype(jnp.float32)
        at = jnp.sum(a * onehot, axis=-1, keepdims=True)
        logpt = logpt * at
    return -_pow_gamma(1.0 - pt, gamma) * logpt


def _focal_kernel_t(gamma, use_alpha, size_average, n_valid, tile_n,
                    x_ref, t_ref, a_ref, out_ref):
    """Transposed layout: x_ref (C, tile_n), samples on lanes."""
    x = x_ref[...].astype(jnp.float32)            # upcast AFTER the native-dtype load
    loss = _loss_classes_on_sublanes(gamma, use_alpha, x, t_ref[...], a_ref)
    if size_average:
        # No wrapper padding: mask the ragged last tile with a SELECT (never a
        # multiply -- the undefined columns may contain NaN/Inf).
        cols = pl.program_id(0) * tile_n + lax.broadcasted_iota(
            jnp.int32, loss.shape, 1)
        loss = jnp.where(cols < n_valid, loss, 0.0)
        out_ref[...] = jnp.full(out_ref.shape, jnp.sum(loss), dtype=out_ref.dtype)
    else:
        # Lane-dense (1, tile_n) store; out-of-bounds lanes of the ragged last
        # tile are discarded by Pallas on writeback.
        out_ref[...] = loss.astype(out_ref.dtype)


def _focal_kernel_rows(gamma, use_alpha, size_average, n_valid, tile_n,
                       x_ref, t_ref, a_ref, out_ref):
    """Natural layout: x_ref (tile_n, C) for C >= 128 (lanes already dense)."""
    x = x_ref[...].astype(jnp.float32)
    loss = _loss_classes_on_lanes(gamma, use_alpha, x, t_ref[...], a_ref)
    if size_average:
        rows = pl.program_id(0) * tile_n + lax.broadcasted_iota(
            jnp.int32, loss.shape, 0)
        loss = jnp.where(rows < n_valid, loss, 0.0)
        out_ref[...] = jnp.full(out_ref.shape, jnp.sum(loss), dtype=out_ref.dtype)
    else:
        # TODO(synk): lane-dense per-sample writeback for this C>=128 path would
        # need an in-kernel (tile_n,1)->(1,tile_n) relayout; kept sublane-
        # oriented for lowering robustness (small-C inputs take the transposed
        # path, which is lane-dense for free).
        out_ref[...] = loss.astype(out_ref.dtype)


def focal_loss(logits, target, *, gamma=0.0, alpha=None, size_average=True,
               max_tile_n=None):
    """JAX/Pallas equivalent of FocalLoss.forward.

    logits: (N, C) float (kernel reads it in its native dtype)
    target: (N,) or (N, 1) int
    alpha : None, python scalar (-> [alpha, 1-alpha]), or per-class weights
    max_tile_n: testing hook to force small tiles (exercises ragged masking).
    """
    if logits.ndim != 2:
        raise ValueError(f"Expected 2-D logits (N, C), got {logits.shape}")
    n, c = logits.shape

    # --- replicate the PyTorch target-shape handling ---
    if target.ndim == 1:
        target = target[:, None]
    elif target.ndim != 2 or target.shape[1] != 1:
        raise ValueError(f"Target must be shape (N,) or (N, 1), got {target.shape}")
    target = target.astype(jnp.int32)

    # --- replicate the PyTorch alpha handling ---
    use_alpha = alpha is not None
    if alpha is None:
        alpha_vec = jnp.ones((c,), dtype=jnp.float32)     # unused by the kernel
    elif isinstance(alpha, (float, int)):
        # TODO(synk): targets >= 2 silently contribute at=0 here instead of
        # PyTorch's runtime gather error.
        k = min(2, c)
        alpha_vec = jnp.zeros((c,), dtype=jnp.float32).at[:k].set(
            jnp.array([alpha, 1.0 - alpha], dtype=jnp.float32)[:k])
    else:
        av = jnp.asarray(alpha, dtype=jnp.float32).reshape(-1)
        if av.shape[0] < c:
            av = jnp.pad(av, (0, c - av.shape[0]))
        alpha_vec = av[:c]

    itemsize = jnp.dtype(logits.dtype).itemsize
    packing = max(1, 4 // max(1, itemsize))

    # --- per-chip VMEM budget (v7x ~64 MiB physical, v5e/v6e ~128 MiB) ---
    try:
        vmem_cap = int(pltpu.get_tpu_info().vmem_capacity_bytes)
    except Exception:
        vmem_cap = 64 * 1024 * 1024                        # conservative (v7x-sized)
    vmem_ceiling = int(min(96 * 1024 * 1024, max(32 * 1024 * 1024, vmem_cap // 2)))
    budget = (vmem_ceiling * 3) // 5                       # headroom for temporaries

    def _cparams(limit):
        return pltpu.CompilerParams(
            dimension_semantics=("parallel",),             # shard tiles across TCs
            vmem_limit_bytes=limit)

    if c < 128:
        # ---- transposed layout: classes on sublanes, samples on lanes ----
        # One-time wrapper relayout to (C, N).  For C << 128 this cuts in-kernel
        # VPU/EUP/XLU work and VMEM ~128/C-fold and makes target + per-sample
        # output lane-dense; the single extra HBM pass for the transpose is far
        # cheaper than the lane waste it removes (kernel is EUP/VPU-bound here).
        rc_pad = _round_up(c, 8 * packing)                 # native-dtype sublane pad
        rc_f32 = _round_up(c, 8)                           # f32 temporaries pad
        per_sample = (2 * (rc_pad * itemsize + 8 * 4)      # 2x-buffered logits+target
                      + 8 * rc_f32 * 4 + 512)              # f32 temps + (1,L) vectors
        tile_n = min(budget // max(per_sample, 1), 65536)
        if max_tile_n is not None:
            tile_n = min(tile_n, max_tile_n)
        if tile_n >= n:
            tile_n = n                                     # single full-extent tile
        else:
            tile_n = max(128, (tile_n // 128) * 128)       # lane-aligned blocks
        num_tiles = pl.cdiv(n, tile_n)
        vmem_limit = int(min(vmem_ceiling,
                             max(32 * 1024 * 1024, 2 * per_sample * tile_n)))

        logits_t = logits.T                                # (C, N)
        target_row = target.reshape(1, n)                  # (1, N), lane-dense
        alpha_col = alpha_vec.reshape(c, 1)

        in_specs = [
            pl.BlockSpec((c, tile_n), lambda i: (0, i)),   # logits tile, native dtype
            pl.BlockSpec((1, tile_n), lambda i: (0, i)),   # targets (lane-dense)
            pl.BlockSpec((c, 1), lambda i: (0, 0)),        # alpha column (resident)
        ]
        kernel = functools.partial(_focal_kernel_t, float(gamma), use_alpha,
                                   size_average, n, tile_n)
        if size_average:
            partials = pl.pallas_call(
                kernel,
                grid=(num_tiles,),
                out_shape=jax.ShapeDtypeStruct((num_tiles, 1, 128), jnp.float32),
                in_specs=in_specs,
                out_specs=pl.BlockSpec((1, 1, 128), lambda i: (i, 0, 0)),
                compiler_params=_cparams(vmem_limit),
            )(logits_t, target_row, alpha_col)
            return jnp.sum(partials[:, 0, 0]) / jnp.float32(n)
        out = pl.pallas_call(
            kernel,
            grid=(num_tiles,),
            out_shape=jax.ShapeDtypeStruct((1, n), jnp.float32),
            in_specs=in_specs,
            out_specs=pl.BlockSpec((1, tile_n), lambda i: (0, i)),
            compiler_params=_cparams(vmem_limit),
        )(logits_t, target_row, alpha_col)
        return out[0]

    # ---- natural (rows, classes) layout: lanes are already dense for C >= 128 ----
    rc = _round_up(c, 128)                                 # lane-padded class dim
    row_align = 8 * packing
    per_row = 2 * (rc * itemsize + 512) + 8 * rc * 4 + 512  # incl. 128-lane target pad
    tile_n = min(budget // max(per_row, 1), 65536)
    if max_tile_n is not None:
        tile_n = min(tile_n, max_tile_n)
    if tile_n >= n:
        tile_n = n
    else:
        tile_n = max(row_align, (tile_n // row_align) * row_align)
    num_tiles = pl.cdiv(n, tile_n)
    vmem_limit = int(min(vmem_ceiling, max(32 * 1024 * 1024, 2 * per_row * tile_n)))

    alpha_row = alpha_vec.reshape(1, c)
    in_specs = [
        pl.BlockSpec((tile_n, c), lambda i: (i, 0)),
        pl.BlockSpec((tile_n, 1), lambda i: (i, 0)),
        pl.BlockSpec((1, c), lambda i: (0, 0)),
    ]
    kernel = functools.partial(_focal_kernel_rows, float(gamma), use_alpha,
                               size_average, n, tile_n)
    if size_average:
        partials = pl.pallas_call(
            kernel,
            grid=(num_tiles,),
            out_shape=jax.ShapeDtypeStruct((num_tiles, 1, 128), jnp.float32),
            in_specs=in_specs,
            out_specs=pl.BlockSpec((1, 1, 128), lambda i: (i, 0, 0)),
            compiler_params=_cparams(vmem_limit),
        )(logits, target, alpha_row)
        return jnp.sum(partials[:, 0, 0]) / jnp.float32(n)
    out = pl.pallas_call(
        kernel,
        grid=(num_tiles,),
        out_shape=jax.ShapeDtypeStruct((n, 1), jnp.float32),
        in_specs=in_specs,
        out_specs=pl.BlockSpec((tile_n, 1), lambda i: (i, 0)),
        compiler_params=_cparams(vmem_limit),
    )(logits, target, alpha_row)
    return out[:, 0]


def _reference_focal_loss(logits, target, gamma, alpha_vec, size_average=True):
    """Pure-JAX reference mirroring the PyTorch module."""
    logits = logits.astype(jnp.float32)
    logp = jax.nn.log_softmax(logits, axis=1)
    t = target.reshape(-1).astype(jnp.int32)
    logpt = jnp.take_along_axis(logp, t[:, None], axis=1)[:, 0]
    pt = jnp.exp(logpt)
    if alpha_vec is not None:
        at = jnp.asarray(alpha_vec, jnp.float32)[t]
        logpt = logpt * at
    loss = -1.0 * (1.0 - pt) ** gamma * logpt
    return jnp.mean(loss) if size_average else loss


if __name__ == "__main__":
    key = jax.random.PRNGKey(0)
    k1, k2, k3, k4, k5, k6 = jax.random.split(key, 6)

    # Case 1: small-C transposed path, f32, per-class alpha list, gamma=2, mean.
    N, C = 16, 8
    gamma = 2.0
    alpha = [0.05 * (i + 1) for i in range(C)]
    logits = jax.random.normal(k1, (N, C), dtype=jnp.float32)
    target = jax.random.randint(k2, (N,), 0, C, dtype=jnp.int32)
    out1 = jax.block_until_ready(focal_loss(logits, target, gamma=gamma, alpha=alpha))
    ref1 = _reference_focal_loss(logits, target, gamma,
                                 jnp.asarray(alpha, jnp.float32))
    assert jnp.allclose(out1, ref1, atol=1e-5, rtol=1e-5), (out1, ref1)

    # Case 2: bf16 logits (native-dtype DMA), alpha=None, non-integer gamma,
    # forced small tiles so the ragged last block exercises the no-pad masking.
    N2, C2 = 300, 8
    logits2 = jax.random.normal(k3, (N2, C2), dtype=jnp.bfloat16)
    target2 = jax.random.randint(k4, (N2,), 0, C2, dtype=jnp.int32)
    out2 = jax.block_until_ready(
        focal_loss(logits2, target2, gamma=1.5, alpha=None, max_tile_n=128))
    ref2 = _reference_focal_loss(logits2, target2, 1.5, None)
    assert jnp.allclose(out2, ref2, atol=1e-4, rtol=1e-4), (out2, ref2)

    # Case 3: per-sample losses (size_average=False), ragged last tile,
    # lane-dense (1, tile_n) writeback with OOB lanes dropped.
    out3 = jax.block_until_ready(
        focal_loss(logits2.astype(jnp.float32), target2, gamma=gamma,
                   alpha=None, size_average=False, max_tile_n=128))
    ref3 = _reference_focal_loss(logits2.astype(jnp.float32), target2, gamma,
                                 None, size_average=False)
    assert out3.shape == (N2,)
    assert jnp.allclose(out3, ref3, atol=1e-5, rtol=1e-5)

    # Cases 4/5: C >= 128 natural-layout path (mean and per-sample), ragged tiles.
    N4, C4 = 50, 128
    alpha4 = [0.02 * ((i % 10) + 1) for i in range(C4)]
    logits4 = jax.random.normal(k5, (N4, C4), dtype=jnp.float32)
    target4 = jax.random.randint(k6, (N4,), 0, C4, dtype=jnp.int32)
    out4 = jax.block_until_ready(
        focal_loss(logits4, target4, gamma=gamma, alpha=alpha4, max_tile_n=24))
    ref4 = _reference_focal_loss(logits4, target4, gamma,
                                 jnp.asarray(alpha4, jnp.float32))
    assert jnp.allclose(out4, ref4, atol=1e-5, rtol=1e-5), (out4, ref4)

    out5 = jax.block_until_ready(
        focal_loss(logits4, target4, gamma=gamma, alpha=alpha4,
                   size_average=False, max_tile_n=24))
    ref5 = _reference_focal_loss(logits4, target4, gamma,
                                 jnp.asarray(alpha4, jnp.float32),
                                 size_average=False)
    assert jnp.allclose(out5, ref5, atol=1e-5, rtol=1e-5)

    # Case 6: scalar alpha -> [alpha, 1 - alpha] (binary focal loss).
    logits6 = jax.random.normal(k1, (32, 2), dtype=jnp.float32)
    target6 = jax.random.randint(k2, (32,), 0, 2, dtype=jnp.int32)
    out6 = jax.block_until_ready(focal_loss(logits6, target6, gamma=2.0, alpha=0.25))
    ref6 = _reference_focal_loss(logits6, target6, 2.0,
                                 jnp.array([0.25, 0.75], jnp.float32))
    assert jnp.allclose(out6, ref6, atol=1e-5, rtol=1e-5), (out6, ref6)

    print("KERNEL_OK")
</pallas_src>

<mosaic_0001>
module attributes {stable_mosaic.version = 11 : i64} {
  func.func @_focal_kernel_t(%arg0: i32, %arg1: memref<8x16xf32, #tpu.memory_space<vmem>>, %arg2: memref<1x16xi32, #tpu.memory_space<vmem>>, %arg3: memref<8x1xf32, #tpu.memory_space<vmem>>, %arg4: memref<1x1x128xf32, #tpu.memory_space<vmem>>) attributes {dimension_semantics = [#tpu.dimension_semantics<parallel>], iteration_bounds = array<i64: 1>, scalar_prefetch = 0 : i64, scratch_operands = 0 : i64, tpu.core_type = #tpu.core_type<tc>, window_params = [{transform_indices = @transform_0, window_bounds = array<i64: 8, 16>}, {transform_indices = @transform_1, window_bounds = array<i64: 1, 16>}, {pipeline_mode = #tpu.pipeline_mode<synchronous>, transform_indices = @transform_2, window_bounds = array<i64: 8, 1>}, {transform_indices = @transform_3, window_bounds = array<i64: 1, 1, 128>}]} {
    %c0 = arith.constant 0 : index
    %c0_0 = arith.constant 0 : index
    %0 = vector.load %arg1[%c0, %c0_0] : memref<8x16xf32, #tpu.memory_space<vmem>>, vector<8x16xf32>
    %c0_1 = arith.constant 0 : index
    %c0_2 = arith.constant 0 : index
    %1 = vector.load %arg2[%c0_1, %c0_2] : memref<1x16xi32, #tpu.memory_space<vmem>>, vector<1x16xi32>
    %cst = arith.constant dense<0xFF800000> : vector<16xf32>
    %2 = vector.multi_reduction <maximumf>, %0, %cst [0] : vector<8x16xf32> to vector<16xf32>
    %3 = vector.shape_cast %2 : vector<16xf32> to vector<1x16xf32>
    %4 = vector.broadcast %3 : vector<1x16xf32> to vector<8x16xf32>
    %5 = arith.subf %0, %4 : vector<8x16xf32>
    %6 = math.exp %5 : vector<8x16xf32>
    %cst_3 = arith.constant dense<0.000000e+00> : vector<16xf32>
    %7 = vector.multi_reduction <add>, %6, %cst_3 [0] : vector<8x16xf32> to vector<16xf32>
    %8 = vector.shape_cast %7 : vector<16xf32> to vector<1x16xf32>
    %9 = math.log %8 : vector<1x16xf32>
    %10 = tpu.iota {dimensions = array<i32: 0>} : vector<8x16xi32>
    %11 = vector.broadcast %1 : vector<1x16xi32> to vector<8x16xi32>
    %12 = arith.cmpi eq, %10, %11 : vector<8x16xi32>
    %13 = arith.extui %12 : vector<8x16xi1> to vector<8x16xi32>
    %14 = arith.sitofp %13 : vector<8x16xi32> to vector<8x16xf32>
    %15 = arith.mulf %5, %14 : vector<8x16xf32>
    %cst_4 = arith.constant dense<0.000000e+00> : vector<16xf32>
    %16 = vector.multi_reduction <add>, %15, %cst_4 [0] : vector<8x16xf32> to vector<16xf32>
    %17 = vector.shape_cast %16 : vector<16xf32> to vector<1x16xf32>
    %18 = arith.subf %17, %9 : vector<1x16xf32>
    %19 = math.exp %18 : vector<1x16xf32>
    %c0_5 = arith.constant 0 : index
    %c0_6 = arith.constant 0 : index
    %20 = vector.load %arg3[%c0_5, %c0_6] : memref<8x1xf32, #tpu.memory_space<vmem>>, vector<8x1xf32>
    %21 = vector.broadcast %20 : vector<8x1xf32> to vector<8x16xf32>
    %22 = arith.mulf %21, %14 : vector<8x16xf32>
    %cst_7 = arith.constant dense<0.000000e+00> : vector<16xf32>
    %23 = vector.multi_reduction <add>, %22, %cst_7 [0] : vector<8x16xf32> to vector<16xf32>
    %24 = vector.shape_cast %23 : vector<16xf32> to vector<1x16xf32>
    %25 = arith.mulf %18, %24 : vector<1x16xf32>
    %cst_8 = arith.constant 1.000000e+00 : f32
    %26 = vector.broadcast %cst_8 : f32 to vector<1x16xf32>
    %27 = arith.subf %26, %19 : vector<1x16xf32>
    %28 = arith.mulf %27, %27 : vector<1x16xf32>
    %cst_9 = arith.constant 0.000000e+00 : f32
    %29 = vector.broadcast %cst_9 : f32 to vector<1x16xf32>
    %30 = arith.subf %29, %28 : vector<1x16xf32>
    %31 = arith.mulf %30, %25 : vector<1x16xf32>
    %c16_i32 = arith.constant 16 : i32
    %32 = arith.muli %arg0, %c16_i32 : i32
    %33 = tpu.iota {dimensions = array<i32: 1>} : vector<1x16xi32>
    %34 = vector.broadcast %32 : i32 to vector<1x16xi32>
    %35 = arith.addi %34, %33 : vector<1x16xi32>
    %c16_i32_10 = arith.constant 16 : i32
    %36 = vector.broadcast %c16_i32_10 : i32 to vector<1x16xi32>
    %37 = arith.cmpi slt, %35, %36 : vector<1x16xi32>
    %cst_11 = arith.constant 0.000000e+00 : f32
    %38 = vector.broadcast %cst_11 : f32 to vector<1x16xf32>
    %39 = arith.select %37, %31, %38 : vector<1x16xi1>, vector<1x16xf32>
    %40 = vector.shape_cast %39 : vector<1x16xf32> to vector<1x1x16xf32>
    %cst_12 = arith.constant dense<0.000000e+00> : vector<1xf32>
    %41 = vector.multi_reduction <add>, %40, %cst_12 [1, 2] : vector<1x1x16xf32> to vector<1xf32>
    %42 = vector.shape_cast %41 : vector<1xf32> to vector<1x1x1xf32>
    %43 = vector.extract %42[0, 0, 0] : f32 from vector<1x1x1xf32>
    %44 = vector.broadcast %43 : f32 to vector<1x1x128xf32>
    %c0_13 = arith.constant 0 : index
    %c0_14 = arith.constant 0 : index
    %c0_15 = arith.constant 0 : index
    %45 = vector.load %arg4[%c0_13, %c0_14, %c0_15] : memref<1x1x128xf32, #tpu.memory_space<vmem>>, vector<1x1x128xf32>
    tpu.vector_store %arg4[%c0_13, %c0_14, %c0_15], %44 {strides = array<i32>} : memref<1x1x128xf32, #tpu.memory_space<vmem>>, vector<1x1x128xf32>,
    return
  }
  func.func @transform_0(%arg0: i32) -> (i32, i32) {
    %c0_i32 = arith.constant 0 : i32
    %c0_i32_0 = arith.constant 0 : i32
    return %c0_i32, %arg0 : i32, i32
  }
  func.func @transform_1(%arg0: i32) -> (i32, i32) {
    %c0_i32 = arith.constant 0 : i32
    %c0_i32_0 = arith.constant 0 : i32
    return %c0_i32, %arg0 : i32, i32
  }
  func.func @transform_2(%arg0: i32) -> (i32, i32) {
    %c0_i32 = arith.constant 0 : i32
    %c0_i32_0 = arith.constant 0 : i32
    %c0_i32_1 = arith.constant 0 : i32
    return %c0_i32, %c0_i32_0 : i32, i32
  }
  func.func @transform_3(%arg0: i32) -> (i32, i32, i32) {
    %c0_i32 = arith.constant 0 : i32
    %c0_i32_0 = arith.constant 0 : i32
    %c0_i32_1 = arith.constant 0 : i32
    return %arg0, %c0_i32, %c0_i32_0 : i32, i32, i32
  }
}

</mosaic_0001>

<bundles_post_ra>
// kernel: tpu_custom_call.1
= control target key start
LH: loop header
LB: loop body
LE: loop exit
PB: predicated region body
PF: predicated region fallthrough
CT: control target
= control target key end

     0   :  { %v148_v1 = vmov 0   ;;  %s196_s0 = inlined_call_operand.vmem [shape: f32[8,16], index: 0, kind: input, shape index: {}]   ;;  %s197_s1 = inlined_call_operand.vmem [shape: s32[1,16], index: 1, kind: input, shape index: {}]   ;;  %s198_s2 = inlined_call_operand.vmem [shape: f32[8,1], index: 2, kind: input, shape index: {}]   ;;  %s199_s3 = inlined_call_operand.hbm [shape: f32[1,1,128], index: 3, kind: output, shape index: {}]  }
   0x1   :  { %v57_v0 = vld [vmem:[%s198_s2] sm:$0xff]  ;;  %117 = vset.pattern.permute.xlu0 %v148_v1 }
   0x2   :  { %8 = vsyncpa [#allocation3], 0  ;;  %60 = vperm.xlu0 %117, %v57_v0   ;;  %v15_v2 = vld [vmem:[%s196_s0] sm:$0xff]  ;;  %vm17_vm0 = vcmask 130048   ;;  %v37_v13 = vlaneseq  ;;  %v149_v19 = vmov 0.0   ;;  %vm83_vm3 = vcmask 122880  }
   0x3   :  { %v18_v3 = vsel %vm17_vm0, %v15_v2, -inf  ;;  %v110_v17 = vld [vmem:[%s197_s1] ss:$0 sm:$0xff]  ;;  %s150_s1 = smov [#allocation2]  }
   0x4   :  { %v19_v4 = vrot.slane %v18_v3, 4  ;;  %v38_v16 = vshrl.u32 %v37_v13, 7  ;;  %v78_v48 = vand.u32 127, %v37_v13  ;;  %s102_s16 = sshll.u32 %s150_s1, 4  ;;  %s103_s16 = int_to_ptr.vmem [resolvable:$true] %s102_s16 }
   0x5   :  { %s124_s18 = scalar_lea.vmem %s103_s16, 16  ;;  %s128_s19 = scalar_lea.vmem %s103_s16, 32 }
   0x6   :  { %v20_v5 = vmax.f32 %v18_v3, %v19_v4  ;;  %vm43_vm1 = vcmp.eq.s32.totalorder %v38_v16, %v110_v17  ;;  %vm81_vm2 = vcmp.lt.s32.totalorder %v78_v48, 16  ;;  %p125_p0 = scmp.ne.s32.totalorder %s103_s16, %s124_s18  ;;  %p129_p1 = scmp.lt.s32.totalorder %s103_s16, %s103_s16 }
   0x7   :  { %v111_v20 = vsel %vm43_vm1, 1.0, %v149_v19  ;;  %p130_p2 = scmp.lt.s32.totalorder %s128_s19, %s124_s18 }
   0x8   :  { %v21_v6 = vrot.slane %v20_v5, 2 }
   0x9   :  { %p131_p3 = por %p130_p2, %p129_p1 }
   0xa   :  { %v22_v7 = vmax.f32 %v20_v5, %v21_v6 }
   0xb   :  { %p132_p4 = pnand %p131_p3, %p125_p0 }
   0xc   :  { %v23_v8 = vrot.slane %v22_v7, 1 }
   0xe   :  { %v24_v9 = vmax.f32 %v22_v7, %v23_v8 }
  0x10   :  { %v25_v10 = vsub.f32 %v15_v2, %v24_v9 }
  0x12   :  { %v26_v11 = vmul.f32 1.442695, %v25_v10  ;;  %v46_v22 = vmul.f32 %v111_v20, %v25_v10 }
  0x14   :  { %118 = vpow2.f32 %v26_v11  ;;  %v47_v24 = vsel %vm17_vm0, %v46_v22, 0.0 }
  0x15   :  { %v48_v26 = vrot.slane %v47_v24, 4 }
  0x17   :  { %v49_v28 = vadd.f32 %v48_v26, %v47_v24 }
  0x19   :  { %v50_v29 = vrot.slane %v49_v28, 2 }
  0x1b   :  { %v51_v30 = vadd.f32 %v50_v29, %v49_v28 }
  0x1d   :  { %v52_v31 = vrot.slane %v51_v30, 1 }
  0x1e   :  { %v119_v12 = vpop.eup %118 }
  0x1f   :  { %v28_v14 = vsel %vm17_vm0, %v119_v12, 0.0  ;;  %v53_v34 = vadd.f32 %v52_v31, %v51_v30 }
  0x20   :  { %v29_v15 = vrot.slane %v28_v14, 4 }
  0x22   :  { %v30_v18 = vadd.f32 %v29_v15, %v28_v14 }
  0x24   :  { %v31_v21 = vrot.slane %v30_v18, 2 }
  0x26   :  { %v32_v23 = vadd.f32 %v31_v21, %v30_v18 }
  0x28   :  { %v33_v25 = vrot.slane %v32_v23, 1 }
  0x2a   :  { %v34_v27 = vadd.f32 %v33_v25, %v32_v23 }
  0x2c   :  { %120 = vlog2.f32 %v34_v27 }
  0x36   :  { %v121_v32 = vpop.eup %120 }
  0x37   :  { %v36_v33 = vmul.f32 0.6931472, %v121_v32 }
  0x39   :  { %v54_v35 = vsub.f32 %v53_v34, %v36_v33 }
  0x3b   :  { %v55_v36 = vmul.f32 1.442695, %v54_v35 }
  0x3d   :  { %122 = vpow2.f32 %v55_v36 }
  0x47   :  { %v123_v39 = vpop.eup %122 }
  0x48   :  { %v72_v43 = vsub.f32 1.0, %v123_v39 }
  0x4a   :  { %v73_v46 = vmul.f32 %v72_v43, %v72_v43 }
  0x4c   :  { %v74_v50 = vsub.f32 0.0, %v73_v46 }
  0x81   :  { %v61_v37 = vpop.permute.xlu0 %60 }
  0x82   :  { %v63_v38 = vmul.f32 %v111_v20, %v61_v37 }
  0x84   :  { %v64_v40 = vsel %vm17_vm0, %v63_v38, 0.0 }
  0x85   :  { %v65_v41 = vrot.slane %v64_v40, 4 }
  0x87   :  { %v66_v42 = vadd.f32 %v65_v41, %v64_v40 }
  0x89   :  { %v67_v44 = vrot.slane %v66_v42, 2 }
  0x8b   :  { %v68_v45 = vadd.f32 %v67_v44, %v66_v42 }
  0x8d   :  { %v69_v47 = vrot.slane %v68_v45, 1 }
  0x8f   :  { %v70_v49 = vadd.f32 %v69_v47, %v68_v45 }
  0x91   :  { %v71_v51 = vmul.f32 %v70_v49, %v54_v35 }
  0x93   :  { %v75_v52 = vmul.f32 %v74_v50, %v71_v51 }
  0x95   :  { %v82_v53 = vsel %vm81_vm2, %v75_v52, 0.0 }
  0x96   :  { %v84_v54 = vsel %vm83_vm3, %v82_v53, 0.0 }
  0x97   :  { %85 = vadd.xlane.f32.xlu0 %v84_v54 }
 0x124   :  { %v86_v55 = vpop.xlane.xlu0 %85 }
 0x125   :  { %v87_v56 = vrot.slane %v86_v55, 4 }
 0x127   :  { %v88_v57 = vadd.f32 %v87_v56, %v86_v55 }
 0x129   :  { %v89_v58 = vrot.slane %v88_v57, 2 }
 0x12b   :  { %v90_v59 = vadd.f32 %v89_v58, %v88_v57 }
 0x12d   :  { %v91_v60 = vrot.slane %v90_v59, 1 }
 0x12f   :  { %v92_v61 = vadd.f32 %v91_v60, %v90_v59 }
 0x131   :  { %112 = vpush %v92_v61 }
 0x162   :  { %s113_s17 = spop %112 }
 0x163   :  { %v94_v62 = vstv %s113_s17 }
 0x164   :  { %95 = vst [vmem:[#allocation2] sm:$0x1] %v94_v62 }
 0x165   :  { %135 = shalt.err (!%p132_p4)
}
 0x166   :  { %s136_s22 = scalar_lea.hbm %s199_s3, 16 }
 0x167   :  { %p137_p5 = scmp.ne.s32.totalorder %s199_s3, %s136_s22  ;;  %p140_p6 = scmp.lt.u32.totalorder %s136_s22, %s199_s3 }
 0x169   :  { %p142_p7 = pnand %p140_p6, %p137_p5 }
 0x16b   :  { %145 = shalt.err (!%p142_p7)
}
 0x16c   :  { %105 = dma.vmem_to_hbm [thread:$0]  %s103_s16, 16, %s199_s3, [#allocation3]  }
 0x16d   :  { %146 = dma.done.wait [#allocation3], 16  }
 0x16e   :  { %147 = vsyncadd [#allocation3], 4294967280 }
 0x16f   :  { %109 = vsyncpa [#allocation3], 1 }

</bundles_post_ra>
